<compile_context>
chip_gen: v6e
topology: v6e:2x2x1
jax: 0.10.0
libtpu: 0.0.40
codegen_flags: <defaults>
</compile_context>

<pallas_src>
import jax
import jax.numpy as jnp
from jax.experimental import pallas as pl
from jax.experimental.pallas import tpu as pltpu


_COMPILER_PARAMS = pltpu.CompilerParams(
    dimension_semantics=("parallel",),
    vmem_limit_bytes=48 * 1024 * 1024,
)


# -----------------------------------------------------------------------------
# Pallas kernels
# -----------------------------------------------------------------------------
def _deconv1_kernel(z_ref, w_ref, scale_ref, shift_ref, o_ref):
    # deconv1 on a 1x1 spatial input is a plain matmul.
    # z_ref:     (1, 1, Cin_pad)      bf16 (latent, zero-padded to 128 lanes)
    # w_ref:     (Cin_pad, 16*Cout)   bf16, column = (kh*4+kw)*Cout + co
    # scale/shift: (1, 16*Cout) f32   fused BN scale/shift tiled over the taps
    # o_ref:     (1, 1, 16*Cout)      bf16
    z = z_ref[0]                                                  # (1, Cin_pad)
    acc = jnp.dot(z, w_ref[...], preferred_element_type=jnp.float32)
    y = jnp.maximum(acc * scale_ref[...] + shift_ref[...], 0.0)
    o_ref[...] = y[None].astype(o_ref.dtype)


def _upconv_bn_relu_kernel(x_ref, w_ref, scale_ref, shift_ref, o_ref):
    # Stride-2 4x4 ConvTranspose2d + fused eval BatchNorm + ReLU via sub-pixel
    # phase decomposition.  Output is phase-major; wrapper interleaves.
    # x_ref:     (1, H+2, W+2, Cin)   bf16, spatially zero-padded input
    # w_ref:     (4, 4*Cin, Cout)     bf16, per phase the 2x2 taps folded on Cin
    # scale/shift: (1, Cout)          f32
    # o_ref:     (1, 4, H, W, Cout)   bf16, out[2r+ph, 2c+pw] = o[2*ph+pw, r, c]
    H = o_ref.shape[2]
    W = o_ref.shape[3]
    x = x_ref[0]                                                  # (H+2, W+2, Cin)
    for ph in range(2):
        for pw in range(2):
            # 2x2 taps of this output phase folded onto the lane axis.
            patch = jnp.concatenate(
                [x[ph + a:ph + a + H, pw + b:pw + b + W, :]
                 for a in (0, 1) for b in (0, 1)],
                axis=-1)                                          # (H, W, 4*Cin)
            acc = jnp.einsum("hwc,co->hwo", patch, w_ref[2 * ph + pw],
                             preferred_element_type=jnp.float32)  # (H, W, Cout)
            y = jnp.maximum(acc * scale_ref[...] + shift_ref[...], 0.0)
            o_ref[0, 2 * ph + pw] = y.astype(o_ref.dtype)


def _upconv_tanh_kernel(x_ref, w_ref, bias_ref, o_ref):
    # Final stride-2 4x4 ConvTranspose2d with Cout=1 + tanh.  A 1-wide MXU
    # matmul would waste 127/128 of the array, so this is a VPU weighted sum
    # plus a lane reduction.  Output is a lane-dense phase-major slab.
    # x_ref:  (1, H+2, W+2, Cin) bf16 ; w_ref: (4, 1, 4*Cin) bf16
    # bias_ref: (1, 1) f32 ; o_ref: (1, H, 4*W) f32  (lanes = [ph, pw, col])
    H = o_ref.shape[1]
    W = o_ref.shape[2] // 4
    x = x_ref[0]
    imgs = []
    for ph in range(2):
        for pw in range(2):
            patch = jnp.concatenate(
                [x[ph + a:ph + a + H, pw + b:pw + b + W, :]
                 for a in (0, 1) for b in (0, 1)],
                axis=-1).astype(jnp.float32)                      # (H, W, 4*Cin)
            wv = w_ref[2 * ph + pw].astype(jnp.float32)           # (1, 4*Cin)
            acc = jnp.sum(patch * wv, axis=-1)                    # (H, W)
            imgs.append(jnp.tanh(acc + bias_ref[...]))
    o_ref[...] = jnp.concatenate(imgs, axis=-1)[None]             # (1, H, 4*W)


# -----------------------------------------------------------------------------
# Wrapper-side glue: weight packing, BN fusion, phase interleave (layout only)
# -----------------------------------------------------------------------------
def _fuse_bn_scale_shift(bias, bn, cout):
    if bn is not None:
        gamma, beta, mean, var, eps = bn
        scale = gamma / jnp.sqrt(var + eps)
        shift = beta + scale * (bias - mean)
    else:
        scale = jnp.ones((cout,), jnp.float32)
        shift = bias
    return (scale.reshape(1, cout).astype(jnp.float32),
            shift.reshape(1, cout).astype(jnp.float32))


def _phase_fold_weights(w_pt):
    """(Cin, Cout, 4, 4) ConvTranspose2d weight (stride 2, pad 1) ->
    (4, 4*Cin, Cout): per output phase p=2*ph+pw, the 2x2 effective taps
    stacked along Cin in the same (a, b) order as the kernel's patch concat."""
    mats = []
    for ph in range(2):
        for pw in range(2):
            taps = [w_pt[:, :, 3 - ph - 2 * a, 3 - pw - 2 * b]
                    for a in (0, 1) for b in (0, 1)]              # each (Cin, Cout)
            mats.append(jnp.concatenate(taps, axis=0))            # (4*Cin, Cout)
    return jnp.stack(mats, axis=0)                                # (4, 4*Cin, Cout)


def _deconv1(z_pad, w_pt, bias, bn):
    n, _, cin_pad = z_pad.shape
    cin, cout, k, _ = w_pt.shape
    w = jnp.pad(w_pt, ((0, cin_pad - cin), (0, 0), (0, 0), (0, 0)))
    w = jnp.transpose(w, (0, 2, 3, 1)).reshape(cin_pad, k * k * cout)
    scale, shift = _fuse_bn_scale_shift(bias, bn, cout)
    scale_t = jnp.tile(scale, (1, k * k))
    shift_t = jnp.tile(shift, (1, k * k))
    out = pl.pallas_call(
        _deconv1_kernel,
        out_shape=jax.ShapeDtypeStruct((n, 1, k * k * cout), jnp.bfloat16),
        grid_spec=pltpu.PrefetchScalarGridSpec(
            num_scalar_prefetch=0,
            grid=(n,),
            in_specs=[
                pl.BlockSpec((1, 1, cin_pad), lambda i: (i, 0, 0)),
                pl.BlockSpec((cin_pad, k * k * cout), lambda i: (0, 0)),
                pl.BlockSpec((1, k * k * cout), lambda i: (0, 0)),
                pl.BlockSpec((1, k * k * cout), lambda i: (0, 0)),
            ],
            out_specs=pl.BlockSpec((1, 1, k * k * cout), lambda i: (i, 0, 0)),
        ),
        compiler_params=_COMPILER_PARAMS,
    )(z_pad, w.astype(jnp.bfloat16), scale_t, shift_t)
    return out.reshape(n, k, k, cout)                             # (n, 4, 4, Cout) bf16


def _upconv_bn_relu(x_nhwc, w_pt, bias, bn):
    n, h, w_, cin = x_nhwc.shape
    cout = w_pt.shape[1]
    xp = jnp.pad(x_nhwc, ((0, 0), (1, 1), (1, 1), (0, 0)))
    wf = _phase_fold_weights(w_pt).astype(jnp.bfloat16)           # (4, 4*cin, cout)
    scale, shift = _fuse_bn_scale_shift(bias, bn, cout)
    out_pm = pl.pallas_call(
        _upconv_bn_relu_kernel,
        out_shape=jax.ShapeDtypeStruct((n, 4, h, w_, cout), jnp.bfloat16),
        grid_spec=pltpu.PrefetchScalarGridSpec(
            num_scalar_prefetch=0,
            grid=(n,),
            in_specs=[
                pl.BlockSpec((1, h + 2, w_ + 2, cin), lambda i: (i, 0, 0, 0)),
                pl.BlockSpec((4, 4 * cin, cout), lambda i: (0, 0, 0)),
                pl.BlockSpec((1, cout), lambda i: (0, 0)),
                pl.BlockSpec((1, cout), lambda i: (0, 0)),
            ],
            out_specs=pl.BlockSpec((1, 4, h, w_, cout),
                                   lambda i: (i, 0, 0, 0, 0)),
        ),
        compiler_params=_COMPILER_PARAMS,
    )(xp, wf, scale, shift)
    # phase-major -> spatially interleaved NHWC (wrapper-side layout plumbing)
    out = out_pm.reshape(n, 2, 2, h, w_, cout)
    out = jnp.transpose(out, (0, 3, 1, 4, 2, 5))                  # (n, h, 2, w, 2, c)
    return out.reshape(n, 2 * h, 2 * w_, cout)


def _upconv_tanh(x_nhwc, w_pt, bias):
    n, h, w_, cin = x_nhwc.shape
    xp = jnp.pad(x_nhwc, ((0, 0), (1, 1), (1, 1), (0, 0)))
    wf = _phase_fold_weights(w_pt)[:, :, 0].astype(jnp.bfloat16)  # (4, 4*cin)
    wf = wf[:, None, :]                                           # (4, 1, 4*cin)
    b = bias.reshape(1, 1).astype(jnp.float32)
    out_pm = pl.pallas_call(
        _upconv_tanh_kernel,
        out_shape=jax.ShapeDtypeStruct((n, h, 4 * w_), jnp.float32),
        grid_spec=pltpu.PrefetchScalarGridSpec(
            num_scalar_prefetch=0,
            grid=(n,),
            in_specs=[
                pl.BlockSpec((1, h + 2, w_ + 2, cin), lambda i: (i, 0, 0, 0)),
                pl.BlockSpec((4, 1, 4 * cin), lambda i: (0, 0, 0)),
                pl.BlockSpec((1, 1), lambda i: (0, 0)),
            ],
            out_specs=pl.BlockSpec((1, h, 4 * w_), lambda i: (i, 0, 0)),
        ),
        compiler_params=_COMPILER_PARAMS,
    )(xp, wf, b)
    # un-shuffle the lane-dense phase-major slab: lanes are [ph, pw, col]
    out = out_pm.reshape(n, h, 2, 2, w_)                          # (n, r, ph, pw, c)
    out = jnp.transpose(out, (0, 1, 2, 4, 3))                     # (n, r, ph, c, pw)
    return out.reshape(n, 2 * h, 2 * w_)


# -----------------------------------------------------------------------------
# Generator: parameter init + forward (NCHW at the boundary, like PyTorch)
# -----------------------------------------------------------------------------
def init_generator_params(key, d=16, z_dim=100):
    # (Cin, Cout, K, stride, pad, has_bn) — mirrors Generator_gan
    specs = [
        (z_dim, d * 8, 4, 1, 0, True),
        (d * 8, d * 4, 4, 2, 1, True),
        (d * 4, d * 2, 4, 2, 1, True),
        (d * 2, d,     4, 2, 1, True),
        (d,     1,     4, 2, 1, False),
    ]
    params = []
    for cin, cout, k, s, p, has_bn in specs:
        key, k1, k2, k3, k4, k5, k6 = jax.random.split(key, 7)
        w = 0.02 * jax.random.normal(k1, (cin, cout, k, k), jnp.float32)
        b = 0.02 * jax.random.normal(k2, (cout,), jnp.float32)
        if has_bn:
            gamma = 1.0 + 0.02 * jax.random.normal(k3, (cout,), jnp.float32)
            beta = 0.02 * jax.random.normal(k4, (cout,), jnp.float32)
            mean = 0.02 * jax.random.normal(k5, (cout,), jnp.float32)
            var = 1.0 + 0.1 * jax.random.uniform(k6, (cout,), jnp.float32)
            bn = (gamma, beta, mean, var, 1e-5)
        else:
            bn = None
        params.append(dict(w=w, b=b, bn=bn, stride=s, pad=p))
    return params


def generator_forward(params, z_nchw):
    """z_nchw: (N, 100, 1, 1) -> (N, 1, 64, 64), matching Generator_gan.forward."""
    n, zdim = z_nchw.shape[0], z_nchw.shape[1]
    cin_pad = ((zdim + 127) // 128) * 128                         # 100 -> 128 lanes
    z = z_nchw.reshape(n, 1, zdim).astype(jnp.float32)
    z = jnp.pad(z, ((0, 0), (0, 0), (0, cin_pad - zdim))).astype(jnp.bfloat16)

    p1, p2, p3, p4, p5 = params
    x = _deconv1(z, p1["w"], p1["b"], p1["bn"])                   # (n, 4, 4, 8d)
    x = _upconv_bn_relu(x, p2["w"], p2["b"], p2["bn"])            # (n, 8, 8, 4d)
    x = _upconv_bn_relu(x, p3["w"], p3["b"], p3["bn"])            # (n, 16, 16, 2d)
    x = _upconv_bn_relu(x, p4["w"], p4["b"], p4["bn"])            # (n, 32, 32, d)
    img = _upconv_tanh(x, p5["w"], p5["b"])                       # (n, 64, 64) f32
    return img[:, None, :, :]                                     # (n, 1, 64, 64)


# -----------------------------------------------------------------------------
# Pure-JAX reference (same precision policy: bf16 conv operands, f32 accum)
# -----------------------------------------------------------------------------
def reference_forward(params, z_nchw):
    x = z_nchw.astype(jnp.float32)
    for p in params:
        w = p["w"]
        K = w.shape[2]
        pe = K - 1 - p["pad"]
        w_conv = jnp.transpose(jnp.flip(w, (2, 3)), (1, 0, 2, 3))  # OIHW
        y = jax.lax.conv_general_dilated(
            x.astype(jnp.bfloat16), w_conv.astype(jnp.bfloat16),
            window_strides=(1, 1),
            padding=[(pe, pe), (pe, pe)],
            lhs_dilation=(p["stride"], p["stride"]),
            dimension_numbers=("NCHW", "OIHW", "NCHW"),
            preferred_element_type=jnp.float32)
        y = y + p["b"][None, :, None, None]
        if p["bn"] is not None:
            g, be, m, v, eps = p["bn"]
            scale = g / jnp.sqrt(v + eps)
            y = (scale[None, :, None, None] * (y - m[None, :, None, None])
                 + be[None, :, None, None])
            x = jnp.maximum(y, 0.0)
        else:
            x = jnp.tanh(y)
    return x


if __name__ == "__main__":
    key = jax.random.PRNGKey(0)
    k_params, k_z = jax.random.split(key)

    d = 16           # small 'd' (module default is 128) to keep shapes small
    batch = 2
    params = init_generator_params(k_params, d=d, z_dim=100)
    z = jax.random.normal(k_z, (batch, 100, 1, 1), jnp.float32)   # NCHW latent

    out = jax.block_until_ready(generator_forward(params, z))
    assert out.shape == (batch, 1, 64, 64), out.shape

    ref = jax.block_until_ready(reference_forward(params, z))
    # kernel and reference share the bf16-operand / f32-accumulate policy, so
    # the residual is summation-order only (well below this bound).
    max_err = float(jnp.max(jnp.abs(out - ref)))
    assert max_err < 5e-3, f"mismatch vs reference: {max_err}"

    print("KERNEL_OK")
</pallas_src>

<mosaic_0001>
module attributes {stable_mosaic.version = 11 : i64} {
  func.func @_deconv1_kernel(%arg0: i32, %arg1: memref<1x1x128xbf16, #tpu.memory_space<vmem>>, %arg2: memref<128x2048xbf16, #tpu.memory_space<vmem>>, %arg3: memref<1x2048xf32, #tpu.memory_space<vmem>>, %arg4: memref<1x2048xf32, #tpu.memory_space<vmem>>, %arg5: memref<1x1x2048xbf16, #tpu.memory_space<vmem>>) attributes {dimension_semantics = [#tpu.dimension_semantics<parallel>], iteration_bounds = array<i64: 2>, scalar_prefetch = 0 : i64, scratch_operands = 0 : i64, tpu.core_type = #tpu.core_type<tc>, window_params = [{transform_indices = @transform_0, window_bounds = array<i64: 1, 1, 128>}, {pipeline_mode = #tpu.pipeline_mode<synchronous>, transform_indices = @transform_1, window_bounds = array<i64: 128, 2048>}, {pipeline_mode = #tpu.pipeline_mode<synchronous>, transform_indices = @transform_2, window_bounds = array<i64: 1, 2048>}, {pipeline_mode = #tpu.pipeline_mode<synchronous>, transform_indices = @transform_3, window_bounds = array<i64: 1, 2048>}, {transform_indices = @transform_4, window_bounds = array<i64: 1, 1, 2048>}]} {
    %c0 = arith.constant 0 : index
    %c0_0 = arith.constant 0 : index
    %c0_1 = arith.constant 0 : index
    %0 = vector.load %arg1[%c0, %c0_0, %c0_1] : memref<1x1x128xbf16, #tpu.memory_space<vmem>>, vector<1x1x128xbf16>
    %1 = vector.shape_cast %0 : vector<1x1x128xbf16> to vector<1x128xbf16>
    %c0_2 = arith.constant 0 : index
    %c0_3 = arith.constant 0 : index
    %2 = vector.load %arg2[%c0_2, %c0_3] : memref<128x2048xbf16, #tpu.memory_space<vmem>>, vector<128x2048xbf16>
    %cst = arith.constant dense<0.000000e+00> : vector<1x2048xf32>
    %3 = tpu.matmul %1, %2, %cst {dimension_numbers = #tpu.dot_dimension_numbers<[1], [0], [0], [1], [0, 0, 1, 1], [], []>} : vector<1x128xbf16>, vector<128x2048xbf16>, vector<1x2048xf32> -> vector<1x2048xf32>
    %c0_4 = arith.constant 0 : index
    %c0_5 = arith.constant 0 : index
    %4 = vector.load %arg3[%c0_4, %c0_5] : memref<1x2048xf32, #tpu.memory_space<vmem>>, vector<1x2048xf32>
    %5 = arith.mulf %3, %4 : vector<1x2048xf32>
    %c0_6 = arith.constant 0 : index
    %c0_7 = arith.constant 0 : index
    %6 = vector.load %arg4[%c0_6, %c0_7] : memref<1x2048xf32, #tpu.memory_space<vmem>>, vector<1x2048xf32>
    %7 = arith.addf %5, %6 : vector<1x2048xf32>
    %cst_8 = arith.constant 0.000000e+00 : f32
    %8 = vector.broadcast %cst_8 : f32 to vector<1x2048xf32>
    %9 = arith.maximumf %7, %8 : vector<1x2048xf32>
    %10 = vector.shape_cast %9 : vector<1x2048xf32> to vector<1x1x2048xf32>
    %11 = arith.truncf %10 : vector<1x1x2048xf32> to vector<1x1x2048xbf16>
    %c0_9 = arith.constant 0 : index
    %c0_10 = arith.constant 0 : index
    %c0_11 = arith.constant 0 : index
    %12 = vector.load %arg5[%c0_9, %c0_10, %c0_11] : memref<1x1x2048xbf16, #tpu.memory_space<vmem>>, vector<1x1x2048xbf16>
    tpu.vector_store %arg5[%c0_9, %c0_10, %c0_11], %11 {strides = array<i32>} : memref<1x1x2048xbf16, #tpu.memory_space<vmem>>, vector<1x1x2048xbf16>,
    return
  }
  func.func @transform_0(%arg0: i32) -> (i32, i32, i32) {
    %c0_i32 = arith.constant 0 : i32
    %c0_i32_0 = arith.constant 0 : i32
    %c0_i32_1 = arith.constant 0 : i32
    return %arg0, %c0_i32, %c0_i32_0 : i32, i32, i32
  }
  func.func @transform_1(%arg0: i32) -> (i32, i32) {
    %c0_i32 = arith.constant 0 : i32
    %c0_i32_0 = arith.constant 0 : i32
    %c0_i32_1 = arith.constant 0 : i32
    return %c0_i32, %c0_i32_0 : i32, i32
  }
  func.func @transform_2(%arg0: i32) -> (i32, i32) {
    %c0_i32 = arith.constant 0 : i32
    %c0_i32_0 = arith.constant 0 : i32
    %c0_i32_1 = arith.constant 0 : i32
    return %c0_i32, %c0_i32_0 : i32, i32
  }
  func.func @transform_3(%arg0: i32) -> (i32, i32) {
    %c0_i32 = arith.constant 0 : i32
    %c0_i32_0 = arith.constant 0 : i32
    %c0_i32_1 = arith.constant 0 : i32
    return %c0_i32, %c0_i32_0 : i32, i32
  }
  func.func @transform_4(%arg0: i32) -> (i32, i32, i32) {
    %c0_i32 = arith.constant 0 : i32
    %c0_i32_0 = arith.constant 0 : i32
    %c0_i32_1 = arith.constant 0 : i32
    return %arg0, %c0_i32, %c0_i32_0 : i32, i32, i32
  }
}

</mosaic_0001>

<bundles_post_ra>
// kernel: tpu_custom_call.1
= control target key start
LH: loop header
LB: loop body
LE: loop exit
PB: predicated region body
PF: predicated region fallthrough
CT: control target
= control target key end

     0   :  { %9 = vsyncpa [#allocation3], 0  ;;  %s2364_s0 = inlined_call_operand.vmem [shape: bf16[2,1,128], index: 0, kind: input, shape index: {}]   ;;  %s2365_s1 = inlined_call_operand.hbm [shape: bf16[128,2048], index: 1, kind: input, shape index: {}]   ;;  %s2366_s2 = inlined_call_operand.hbm [shape: f32[1,2048], index: 2, kind: input, shape index: {}]   ;;  %s2367_s3 = inlined_call_operand.hbm [shape: f32[1,2048], index: 3, kind: input, shape index: {}]   ;;  %s2368_s4 = inlined_call_operand.vmem [shape: bf16[2,1,2048], index: 4, kind: output, shape index: {}]  }
   0x1   :  { %10 = vsyncpa [#allocation5], 0  ;;  %s2113_s15 = smov 0  }
   0x2 LB: > { %s2081_s16 = smov [#allocation4]   ;;  %s2119_s18 = sadd.s32 4294967295, %s2079_s15   ;;  %s2079_s15 = sphi %s2113_s15, %s16_s15  }
   0x3   : > { %s162_s17 = sshll.u32 %s2081_s16, 4  ;;  %p1796_p0 = scmp.ge.s32.totalorder %s2079_s15, 1  ;;  %s163_s17 = int_to_ptr.vmem [resolvable:$true] %s162_s17 }
   0x4   : > { %p136_p1 = scmp.lt.s32.totalorder %s2079_s15, 3  ;;  %p2369_p2 = scmp.eq.s32.totalorder %s2119_s18, 0 }
   0x5   : > { %s2082_s20 = smov [#allocation2]   ;;  %s2083_s23 = smov [#allocation6]  }
   0x6   : > { %p2124_p3 = pnand %p1796_p0, %p136_p1  ;;  %s148_s21 = sshll.u32 %s2082_s20, 4  ;;  %s149_s21 = int_to_ptr.vmem [resolvable:$true] %s148_s21 }
   0x7   : > { %s173_s24 = sshll.u32 %s2083_s23, 4  ;;  %s1998_s25 = scalar_lea.vmem %s163_s17, 256  ;;  %s2136_s24 = int_to_ptr.vmem [resolvable:$true] %s173_s24 }
   0x8   : > { %s2371_s19 = scalar_select %p2124_p3, 1, 0 }
   0x9   : > { %p1956_p4 = pneg %p2124_p3  ;;  %p1999_p7 = scmp.ne.s32.totalorder %s163_s17, %s1998_s25 }
   0xa   : > { %p2006_p10 = scmp.lt.s32.totalorder %s163_s17, %s163_s17  ;;  %p2007_p11 = scmp.lt.s32.totalorder %s1998_s25, %s1998_s25 }
   0xb   : > { %p2132_p5 = pnand %p2369_p2, %p1956_p4 }
   0xc   : > { %p2008_p12 = por %p2007_p11, %p2006_p10 }
   0xd   : > { %p1989_p6 = pneg %p2132_p5 }
   0xf   : > { %p2001_p8 = pnand %p1999_p7, %p1989_p6 }
  0x11   : > { %p2002_p9 = pneg %p2001_p8 }
  0x13   : > { %p2009_p13 = pnand %p2008_p12, %p2002_p9 }
  0x15   : > { %2012 = shalt.err (!%p2009_p13)
}
  0x16   : > { %1962 = dma.hbm_to_vmem [thread:$0]  (!%p2132_p5), %s2366_s2, 256, %s163_s17, [#allocation5]  }
  0x17   : > { %s2024_s28 = scalar_lea.vmem %s149_s21, 16384  ;;  %p2032_p7 = scmp.lt.s32.totalorder %s149_s21, %s149_s21 }
  0x18   : > { %p2025_p0 = scmp.ne.s32.totalorder %s149_s21, %s2024_s28  ;;  %p2033_p8 = scmp.lt.s32.totalorder %s2024_s28, %s2024_s28 }
  0x1a   : > { %p2027_p1 = pnand %p2025_p0, %p1989_p6  ;;  %p2034_p2 = por %p2033_p8, %p2032_p7 }
  0x1c   : > { %p2028_p4 = pneg %p2027_p1 }
  0x1e   : > { %p2035_p3 = pnand %p2034_p2, %p2028_p4 }
  0x20   : > { %2038 = shalt.err (!%p2035_p3)
}
  0x21   : > { %s2084_s29 = smov 1024   ;;  %s2085_s30 = smov 64  }
  0x22   : > { %1959 = dma.hbm_to_vmem [thread:$0]  (!%p2132_p5), %s2365_s1, 16384, %s149_s21, [#allocation3], %s2084_s29, %s2084_s29, %s2085_s30  }
  0x23   : > { %s2050_s7 = scalar_lea.vmem %s2136_s24, 256  ;;  %p2058_p2 = scmp.lt.s32.totalorder %s2136_s24, %s2136_s24 }
  0x24   : > { %p2051_p9 = scmp.ne.s32.totalorder %s2136_s24, %s2050_s7  ;;  %p2059_p3 = scmp.lt.s32.totalorder %s2050_s7, %s2050_s7 }
  0x26   : > { %p2053_p10 = pnand %p2051_p9, %p1989_p6  ;;  %p2060_p12 = por %p2059_p3, %p2058_p2 }
  0x28   : > { %p2054_p11 = pneg %p2053_p10 }
  0x2a   : > { %p2061_p13 = pnand %p2060_p12, %p2054_p11 }
  0x2c   : > { %2064 = shalt.err (!%p2061_p13)
}
  0x2d   : > { %1965 = dma.hbm_to_vmem [thread:$0]  (!%p2132_p5), %s2367_s3, 256, %s2136_s24, [#allocation5]  }
  0x2e   : > { %p2373_p0 = scmp.ne.s32.totalorder %s2371_s19, 0 }
  0x2f   : > { %p2374_p1 = scmp.eq.s32.totalorder (!%p2373_p0), %s2119_s18, 0 }
  0x30   : > { %192 = sbr.rel (%p2373_p0) target bundleno = 402 (0x192), region = 36 }
  0x35   : > { %2070 = dma.done.wait (%p2374_p1), [#allocation3], 16384   ;;  %p2375_p6 = pmov %p2374_p1 }
  0x36   : > { %p2376_p4 = pmov %p2374_p1 }
  0x37   : > { %2072 = vsyncadd (%p2375_p6), [#allocation3], 4294950912 }
  0x38   : > { %2074 = dma.done.wait (%p2376_p4), [#allocation5], 512   ;;  %p2377_p7 = pmov %p2374_p1 }
  0x39   : > { %v2086_v0 = vmov 0   ;;  %v344_v1 = vld [vmem:[#allocation2 + $0x380] sm:$0xff]  ;;  %v345_v3 = vld [vmem:[#allocation2 + $0x388] sm:$0xff]  ;;  %p223_p5 = scmp.lt.s32.totalorder %s2119_s18, 1  ;;  %v346_v63 = vld [vmem:[#allocation2 + $0x390] sm:$0xff]  ;;  %vm1676_vm0 = vcmask 1040384  }
  0x3a   : > { %2076 = vsyncadd (%p2377_p7), [#allocation5], 4294966784  ;;  %1032 = vmatprep.mubr.bf16.mxu0 %v2086_v0  ;;  %1073 = vmatprep.mubr.bf16.mxu1 %v2086_v0  ;;  %v352_v2 = vld [vmem:[#allocation2 + $0x3c0] sm:$0xff]  ;;  %v353_v5 = vld [vmem:[#allocation2 + $0x3c8] sm:$0xff]  ;;  %vm1677_vm1 = vsmask.f32 256 }
  0x3b   : > { %v1919_v4 = vcombine.high %v344_v1, %v352_v2  ;;  %v1918_v6 = vcombine.low %v344_v1, %v352_v2  ;;  %v328_v7 = vld [vmem:[#allocation2 + $0x300] sm:$0xff]  ;;  %v1921_v9 = vcombine.high %v345_v3, %v353_v5  ;;  %v1920_v10 = vcombine.low %v345_v3, %v353_v5  ;;  %v329_v12 = vld [vmem:[#allocation2 + $0x308] sm:$0xff]  ;;  %s2395_s18 = smov (!%p223_p5, %s2119_s18), 1  ;;  %v354_v1 = vld [vmem:[#allocation2 + $0x3d0] sm:$0xff] }
  0x3c   : > { %v336_v8 = vld [vmem:[#allocation2 + $0x340] sm:$0xff]  ;;  %v337_v13 = vld [vmem:[#allocation2 + $0x348] sm:$0xff]  ;;  %v347_v2 = vld [vmem:[#allocation2 + $0x398] sm:$0xff]  ;;  %s225_s12 = scalar_lea.vmem %s2364_s0, %s2395_s18  ;;  %vm1679_vm2 = vcmask 1041409   ;;  %vm1680_vm3 = vsmask.f32 1280 }
  0x3d   : > { %v1903_v11 = vcombine.high %v328_v7, %v336_v8  ;;  %v312_v14 = vld [vmem:[#allocation2 + $0x280] sm:$0xff]  ;;  %1000 = vmatprep.subr.bf16.mxu0 %v1919_v4  ;;  %v1905_v15 = vcombine.high %v329_v12, %v337_v13  ;;  %v313_v17 = vld [vmem:[#allocation2 + $0x288] sm:$0xff]  ;;  %1041 = vmatprep.subr.bf16.mxu1 %v1921_v9  ;;  %v1902_v19 = vcombine.low %v328_v7, %v336_v8  ;;  %v355_v3 = vld [vmem:[#allocation2 + $0x3d8] sm:$0xff]  ;;  %vm1683_vm6 = vcmask 1042434   ;;  %s1805_s13 = sshll.u32 %s2395_s18, 4 }
  0x3e   : > { %v320_v16 = vld [vmem:[#allocation2 + $0x2c0] sm:$0xff]  ;;  %v321_v18 = vld [vmem:[#allocation2 + $0x2c8] sm:$0xff]  ;;  %1001 = vmatpush1.bf16.msra.mxu0 %v1918_v6  ;;  %1042 = vmatpush1.bf16.msra.mxu1 %v1920_v10  ;;  %v1904_v20 = vcombine.low %v329_v12, %v337_v13  ;;  %v1923_v6 = vcombine.high %v346_v63, %v354_v1  ;;  %v1925_v7 = vcombine.high %v347_v2, %v355_v3  ;;  %v330_v8 = vld [vmem:[#allocation2 + $0x310] sm:$0xff]  ;;  %vm1684_vm7 = vsmask.f32 2304  ;;  %s2313_s17 = scalar_lea.vmem %s2368_s4, %s1805_s13 }
  0x3f   : > { %1002 = vmatprep.subr.bf16.mxu0 %v1903_v11  ;;  %v1887_v21 = vcombine.high %v312_v14, %v320_v16  ;;  %1043 = vmatprep.subr.bf16.mxu1 %v1905_v15  ;;  %v1889_v22 = vcombine.high %v313_v17, %v321_v18  ;;  %v296_v23 = vld [vmem:[#allocation2 + $0x200] sm:$0xff]  ;;  %v297_v25 = vld [vmem:[#allocation2 + $0x208] sm:$0xff]  ;;  %v1886_v27 = vcombine.low %v312_v14, %v320_v16  ;;  %v338_v9 = vld [vmem:[#allocation2 + $0x350] sm:$0xff]  ;;  %vm1687_vm10 = vcmask 1043459  }
  0x40   : > { %v304_v24 = vld [vmem:[#allocation2 + $0x240] sm:$0xff]  ;;  %v305_v26 = vld [vmem:[#allocation2 + $0x248] sm:$0xff]  ;;  %v1888_v28 = vcombine.low %v313_v17, %v321_v18  ;;  %v331_v10 = vld [vmem:[#allocation2 + $0x318] sm:$0xff]  ;;  %v1922_v13 = vcombine.low %v346_v63, %v354_v1  ;;  %v1924_v14 = vcombine.low %v347_v2, %v355_v3  ;;  %v1907_v15 = vcombine.high %v330_v8, %v338_v9 }
  0x41   : > { %v1871_v29 = vcombine.high %v296_v23, %v304_v24  ;;  %v1873_v30 = vcombine.high %v297_v25, %v305_v26  ;;  %v280_v31 = vld [vmem:[#allocation2 + $0x180] sm:$0xff]  ;;  %v281_v33 = vld [vmem:[#allocation2 + $0x188] sm:$0xff]  ;;  %v1870_v35 = vcombine.low %v296_v23, %v304_v24  ;;  %v1872_v36 = vcombine.low %v297_v25, %v305_v26  ;;  %v339_v11 = vld [vmem:[#allocation2 + $0x358] sm:$0xff] }
  0x42   : > { %1003 = vmatpush1.bf16.msra.mxu0 %v1902_v19  ;;  %1044 = vmatpush1.bf16.msra.mxu1 %v1904_v20  ;;  %v288_v32 = vld [vmem:[#allocation2 + $0x1c0] sm:$0xff]  ;;  %v289_v34 = vld [vmem:[#allocation2 + $0x1c8] sm:$0xff]  ;;  %v1909_v16 = vcombine.high %v331_v10, %v339_v11  ;;  %v314_v17 = vld [vmem:[#allocation2 + $0x290] sm:$0xff]  ;;  %vm1688_vm11 = vsmask.f32 3328  ;;  %vm1691_vm14 = vcmask 1044484  }
  0x43   : > { %1004 = vmatprep.subr.bf16.mxu0 %v1887_v21  ;;  %1045 = vmatprep.subr.bf16.mxu1 %v1889_v22  ;;  %v1855_v37 = vcombine.high %v280_v31, %v288_v32  ;;  %v1857_v38 = vcombine.high %v281_v33, %v289_v34  ;;  %v264_v39 = vld [vmem:[#allocation2 + $0x100] sm:$0xff]  ;;  %v265_v41 = vld [vmem:[#allocation2 + $0x108] sm:$0xff]  ;;  %v1854_v43 = vcombine.low %v280_v31, %v288_v32  ;;  %v322_v18 = vld [vmem:[#allocation2 + $0x2d0] sm:$0xff]  ;;  %vm1692_vm15 = vsmask.f32 4352 }
  0x44   : > { %v272_v40 = vld [vmem:[#allocation2 + $0x140] sm:$0xff]  ;;  %v273_v42 = vld [vmem:[#allocation2 + $0x148] sm:$0xff]  ;;  %v1856_v44 = vcombine.low %v281_v33, %v289_v34  ;;  %v315_v19 = vld [vmem:[#allocation2 + $0x298] sm:$0xff]  ;;  %v1906_v21 = vcombine.low %v330_v8, %v338_v9  ;;  %v1908_v22 = vcombine.low %v331_v10, %v339_v11  ;;  %v1891_v23 = vcombine.high %v314_v17, %v322_v18 }
  0x45   : > { %v1839_v45 = vcombine.high %v264_v39, %v272_v40  ;;  %v1841_v46 = vcombine.high %v265_v41, %v273_v42  ;;  %v248_v47 = vld [vmem:[#allocation2 + $0x80] sm:$0xff]  ;;  %v249_v49 = vld [vmem:[#allocation2 + $0x88] sm:$0xff]  ;;  %v1838_v51 = vcombine.low %v264_v39, %v272_v40  ;;  %v1840_v52 = vcombine.low %v265_v41, %v273_v42  ;;  %v323_v20 = vld [vmem:[#allocation2 + $0x2d8] sm:$0xff] }
  0x46   : > { %1005 = vmatpush1.bf16.msra.mxu0 %v1886_v27  ;;  %1046 = vmatpush1.bf16.msra.mxu1 %v1888_v28  ;;  %v256_v48 = vld [vmem:[#allocation2 + $0xc0] sm:$0xff]  ;;  %v257_v50 = vld [vmem:[#allocation2 + $0xc8] sm:$0xff]  ;;  %v1893_v24 = vcombine.high %v315_v19, %v323_v20  ;;  %v298_v25 = vld [vmem:[#allocation2 + $0x210] sm:$0xff] }
  0x47   : > { %1006 = vmatprep.subr.bf16.mxu0 %v1871_v29  ;;  %1047 = vmatprep.subr.bf16.mxu1 %v1873_v30  ;;  %v1823_v53 = vcombine.high %v248_v47, %v256_v48  ;;  %v1825_v54 = vcombine.high %v249_v49, %v257_v50  ;;  %v232_v55 = vld [vmem:[#allocation2] sm:$0xff]  ;;  %v233_v57 = vld [vmem:[#allocation2 + $0x8] sm:$0xff]  ;;  %v1822_v59 = vcombine.low %v248_v47, %v256_v48  ;;  %v306_v26 = vld [vmem:[#allocation2 + $0x250] sm:$0xff] }
  0x48   : > { %v240_v56 = vld [vmem:[#allocation2 + $0x40] sm:$0xff]  ;;  %v241_v58 = vld [vmem:[#allocation2 + $0x48] sm:$0xff]  ;;  %v1824_v60 = vcombine.low %v249_v49, %v257_v50  ;;  %v299_v27 = vld [vmem:[#allocation2 + $0x218] sm:$0xff]  ;;  %v1890_v29 = vcombine.low %v314_v17, %v322_v18  ;;  %v1892_v30 = vcombine.low %v315_v19, %v323_v20  ;;  %v1875_v31 = vcombine.high %v298_v25, %v306_v26 }
  0x49   : > { %v1807_v61 = vcombine.high %v232_v55, %v240_v56  ;;  %v1809_v62 = vcombine.high %v233_v57, %v241_v58  ;;  %v1806_v4 = vcombine.low %v232_v55, %v240_v56  ;;  %v1808_v5 = vcombine.low %v233_v57, %v241_v58  ;;  %v2189_v12 = vld [vmem:[%s225_s12] sm:$0x1]  ;;  %v307_v28 = vld [vmem:[#allocation2 + $0x258] sm:$0xff]  ;;  %v282_v33 = vld [vmem:[#allocation2 + $0x190] sm:$0xff] }
  0x4a   : > { %1007 = vmatpush1.bf16.msra.mxu0 %v1870_v35  ;;  %1048 = vmatpush1.bf16.msra.mxu1 %v1872_v36  ;;  %v1877_v32 = vcombine.high %v299_v27, %v307_v28  ;;  %v290_v34 = vld [vmem:[#allocation2 + $0x1d0] sm:$0xff]  ;;  %v283_v35 = vld [vmem:[#allocation2 + $0x198] sm:$0xff]  ;;  %v348_v2 = vld [vmem:[#allocation2 + $0x3a0] sm:$0xff] }
  0x4b   : > { %1008 = vmatprep.subr.bf16.mxu0 %v1855_v37  ;;  %1049 = vmatprep.subr.bf16.mxu1 %v1857_v38  ;;  %v291_v36 = vld [vmem:[#allocation2 + $0x1d8] sm:$0xff]  ;;  %v1874_v37 = vcombine.low %v298_v25, %v306_v26  ;;  %v1876_v38 = vcombine.low %v299_v27, %v307_v28  ;;  %v1859_v39 = vcombine.high %v282_v33, %v290_v34  ;;  %v266_v41 = vld [vmem:[#allocation2 + $0x110] sm:$0xff]  ;;  %v356_v3 = vld [vmem:[#allocation2 + $0x3e0] sm:$0xff] }
  0x4c   : > { %v1861_v40 = vcombine.high %v283_v35, %v291_v36  ;;  %v274_v42 = vld [vmem:[#allocation2 + $0x150] sm:$0xff]  ;;  %v1927_v8 = vcombine.high %v348_v2, %v356_v3  ;;  %v332_v10 = vld [vmem:[#allocation2 + $0x320] sm:$0xff]  ;;  %vm2225_vm4 = vmand %vm1676_vm0, %vm1677_vm1 }
  0x4d   : > { %v1843_v47 = vcombine.high %v266_v41, %v274_v42  ;;  %v250_v49 = vld [vmem:[#allocation2 + $0x90] sm:$0xff]  ;;  %v340_v11 = vld [vmem:[#allocation2 + $0x360] sm:$0xff]  ;;  %vm2235_vm5 = vmand %vm1679_vm2, %vm1680_vm3  ;;  %vm1695_vm2 = vcmask 1045509   ;;  %vm1696_vm3 = vsmask.f32 5376 }
  0x4e   : > { %1009 = vmatpush1.bf16.msra.mxu0 %v1854_v43  ;;  %1050 = vmatpush1.bf16.msra.mxu1 %v1856_v44  ;;  %v267_v43 = vld [vmem:[#allocation2 + $0x118] sm:$0xff]  ;;  %v258_v50 = vld [vmem:[#allocation2 + $0xd0] sm:$0xff]  ;;  %v1911_v17 = vcombine.high %v332_v10, %v340_v11  ;;  %v316_v19 = vld [vmem:[#allocation2 + $0x2a0] sm:$0xff] }
  0x4f   : > { %1010 = vmatprep.subr.bf16.mxu0 %v1839_v45  ;;  %1051 = vmatprep.subr.bf16.mxu1 %v1841_v46  ;;  %v275_v44 = vld [vmem:[#allocation2 + $0x158] sm:$0xff]  ;;  %v1858_v45 = vcombine.low %v282_v33, %v290_v34  ;;  %v1860_v46 = vcombine.low %v283_v35, %v291_v36  ;;  %v1827_v55 = vcombine.high %v250_v49, %v258_v50  ;;  %v234_v57 = vld [vmem:[#allocation2 + $0x10] sm:$0xff]  ;;  %v324_v20 = vld [vmem:[#allocation2 + $0x2e0] sm:$0xff] }
  0x50   : > { %v1845_v48 = vcombine.high %v267_v43, %v275_v44  ;;  %v242_v58 = vld [vmem:[#allocation2 + $0x50] sm:$0xff]  ;;  %v1895_v25 = vcombine.high %v316_v19, %v324_v20  ;;  %v300_v27 = vld [vmem:[#allocation2 + $0x220] sm:$0xff]  ;;  %vm1682_vm8 = vmor %vm2235_vm5, %vm2225_vm4 }
  0x51   : > { %v1811_v63 = vcombine.high %v234_v57, %v242_v58  ;;  %v308_v28 = vld [vmem:[#allocation2 + $0x260] sm:$0xff]  ;;  %vm1685_vm9 = vmand %vm1683_vm6, %vm1684_vm7  ;;  %vm1699_vm6 = vcmask 1046534   ;;  %vm1700_vm7 = vsmask.f32 6400 }
  0x52   : > { %1011 = vmatpush1.bf16.msra.mxu0 %v1838_v51  ;;  %1052 = vmatpush1.bf16.msra.mxu1 %v1840_v52  ;;  %v251_v51 = vld [vmem:[#allocation2 + $0x98] sm:$0xff]  ;;  %v1879_v33 = vcombine.high %v300_v27, %v308_v28  ;;  %v284_v35 = vld [vmem:[#allocation2 + $0x1a0] sm:$0xff]  ;;  %vm2255_vm12 = vmor %vm1685_vm9, %vm1682_vm8 }
  0x53   : > { %1012 = vmatprep.subr.bf16.mxu0 %v1823_v53  ;;  %1053 = vmatprep.subr.bf16.mxu1 %v1825_v54  ;;  %v259_v52 = vld [vmem:[#allocation2 + $0xd8] sm:$0xff]  ;;  %v1842_v53 = vcombine.low %v266_v41, %v274_v42  ;;  %v1844_v54 = vcombine.low %v267_v43, %v275_v44  ;;  %v292_v36 = vld [vmem:[#allocation2 + $0x1e0] sm:$0xff]  ;;  %vm2265_vm13 = vmand %vm1687_vm10, %vm1688_vm11  ;;  %vm1703_vm10 = vcmask 1047559   ;;  %vm1704_vm11 = vsmask.f32 7424 }
  0x54   : > { %v1829_v56 = vcombine.high %v251_v51, %v259_v52  ;;  %v1863_v41 = vcombine.high %v284_v35, %v292_v36  ;;  %v268_v43 = vld [vmem:[#allocation2 + $0x120] sm:$0xff]  ;;  %vm1690_vm0 = vmor %vm2265_vm13, %vm2255_vm12 }
  0x55   : > { %v276_v44 = vld [vmem:[#allocation2 + $0x160] sm:$0xff]  ;;  %vm1693_vm1 = vmand %vm1691_vm14, %vm1692_vm15 }
  0x56   : > { %1013 = vmatpush1.bf16.msra.mxu0 %v1822_v59  ;;  %1054 = vmatpush1.bf16.msra.mxu1 %v1824_v60  ;;  %v235_v59 = vld [vmem:[#allocation2 + $0x18] sm:$0xff]  ;;  %vm2289_vm4 = vmor %vm1693_vm1, %vm1690_vm0 }
  0x57   : > { %1014 = vmatprep.subr.bf16.mxu0 %v1807_v61  ;;  %1055 = vmatprep.subr.bf16.mxu1 %v1809_v62  ;;  %v243_v60 = vld [vmem:[#allocation2 + $0x58] sm:$0xff]  ;;  %v1826_v61 = vcombine.low %v250_v49, %v258_v50  ;;  %v1828_v62 = vcombine.low %v251_v51, %v259_v52  ;;  %v1847_v49 = vcombine.high %v268_v43, %v276_v44  ;;  %v252_v51 = vld [vmem:[#allocation2 + $0xa0] sm:$0xff]  ;;  %vm2293_vm5 = vmand %vm1695_vm2, %vm1696_vm3 }
  0x58   : > { %v1813_v1 = vcombine.high %v235_v59, %v243_v60  ;;  %v260_v52 = vld [vmem:[#allocation2 + $0xe0] sm:$0xff]  ;;  %vm1698_vm8 = vmor %vm2293_vm5, %vm2289_vm4 }
  0x59   : > { %vm1701_vm9 = vmand %vm1699_vm6, %vm1700_vm7 }
  0x5a   : > { %1015 = vmatpush1.bf16.msra.mxu0 %v1806_v4  ;;  %1056 = vmatpush1.bf16.msra.mxu1 %v1808_v5  ;;  %v349_v4 = vld [vmem:[#allocation2 + $0x3a8] sm:$0xff]  ;;  %vm2306_vm12 = vmor %vm1701_vm9, %vm1698_vm8 }
  0x5b   : > { %1082 = vmatprep.subr.bf16.mxu0 %v1923_v6  ;;  %1123 = vmatprep.subr.bf16.mxu1 %v1925_v7  ;;  %v357_v5 = vld [vmem:[#allocation2 + $0x3e8] sm:$0xff]  ;;  %v1810_v6 = vcombine.low %v234_v57, %v242_v58  ;;  %v1812_v7 = vcombine.low %v235_v59, %v243_v60  ;;  %v1831_v57 = vcombine.high %v252_v51, %v260_v52  ;;  %v236_v59 = vld [vmem:[#allocation2 + $0x20] sm:$0xff]  ;;  %vm2315_vm13 = vmand %vm1703_vm10, %vm1704_vm11 }
  0x5c   : > { %v1929_v9 = vcombine.high %v349_v4, %v357_v5  ;;  %v244_v60 = vld [vmem:[#allocation2 + $0x60] sm:$0xff]  ;;  %vm1706_vm14 = vmor %vm2315_vm13, %vm2306_vm12 }
  0x5d   : > { %1033 = vmatmul.mubr.bf16.vlgmr.msra.gmra.mxu0 %v2189_v12  ;;  %1074 = vmatmul.mubr.bf16.vlgmr.msra.gmra.mxu1 %v2189_v12 }
  0x5e   : > { %1083 = vmatpush1.bf16.msra.mxu0 %v1922_v13  ;;  %1124 = vmatpush1.bf16.msra.mxu1 %v1924_v14  ;;  %v333_v13 = vld [vmem:[#allocation2 + $0x328] sm:$0xff] }
  0x5f   : > { %1084 = vmatprep.subr.bf16.mxu0 %v1907_v15  ;;  %1125 = vmatprep.subr.bf16.mxu1 %v1909_v16  ;;  %v341_v14 = vld [vmem:[#allocation2 + $0x368] sm:$0xff]  ;;  %v1926_v15 = vcombine.low %v348_v2, %v356_v3  ;;  %v1928_v16 = vcombine.low %v349_v4, %v357_v5  ;;  %v1815_v2 = vcombine.high %v236_v59, %v244_v60  ;;  %v350_v4 = vld [vmem:[#allocation2 + $0x3b0] sm:$0xff] }
  0x60   : > { %1114 = vmatprep.mubr.bf16.mxu0 %v2086_v0  ;;  %1155 = vmatprep.mubr.bf16.mxu1 %v2086_v0  ;;  %v1913_v18 = vcombine.high %v333_v13, %v341_v14  ;;  %v358_v5 = vld [vmem:[#allocation2 + $0x3f0] sm:$0xff] }
  0x62   : > { %1085 = vmatpush1.bf16.msra.mxu0 %v1906_v21  ;;  %1126 = vmatpush1.bf16.msra.mxu1 %v1908_v22  ;;  %v317_v21 = vld [vmem:[#allocation2 + $0x2a8] sm:$0xff] }
  0x63   : > { %1086 = vmatprep.subr.bf16.mxu0 %v1891_v23  ;;  %1127 = vmatprep.subr.bf16.mxu1 %v1893_v24  ;;  %v325_v22 = vld [vmem:[#allocation2 + $0x2e8] sm:$0xff]  ;;  %v1910_v23 = vcombine.low %v332_v10, %v340_v11  ;;  %v1912_v24 = vcombine.low %v333_v13, %v341_v14  ;;  %v1931_v10 = vcombine.high %v350_v4, %v358_v5  ;;  %v334_v13 = vld [vmem:[#allocation2 + $0x330] sm:$0xff] }
  0x64   : > { %v1897_v26 = vcombine.high %v317_v21, %v325_v22  ;;  %v342_v14 = vld [vmem:[#allocation2 + $0x370] sm:$0xff] }
  0x66   : > { %1087 = vmatpush1.bf16.msra.mxu0 %v1890_v29  ;;  %1128 = vmatpush1.bf16.msra.mxu1 %v1892_v30  ;;  %v301_v29 = vld [vmem:[#allocation2 + $0x228] sm:$0xff] }
  0x67   : > { %1088 = vmatprep.subr.bf16.mxu0 %v1875_v31  ;;  %1129 = vmatprep.subr.bf16.mxu1 %v1877_v32  ;;  %v309_v30 = vld [vmem:[#allocation2 + $0x268] sm:$0xff]  ;;  %v1894_v31 = vcombine.low %v316_v19, %v324_v20  ;;  %v1896_v32 = vcombine.low %v317_v21, %v325_v22  ;;  %v1915_v19 = vcombine.high %v334_v13, %v342_v14  ;;  %v318_v21 = vld [vmem:[#allocation2 + $0x2b0] sm:$0xff] }
  0x68   : > { %v1881_v34 = vcombine.high %v301_v29, %v309_v30  ;;  %v326_v22 = vld [vmem:[#allocation2 + $0x2f0] sm:$0xff] }
  0x6a   : > { %1089 = vmatpush1.bf16.msra.mxu0 %v1874_v37  ;;  %1130 = vmatpush1.bf16.msra.mxu1 %v1876_v38  ;;  %v285_v37 = vld [vmem:[#allocation2 + $0x1a8] sm:$0xff] }
  0x6b   : > { %1090 = vmatprep.subr.bf16.mxu0 %v1859_v39  ;;  %1131 = vmatprep.subr.bf16.mxu1 %v1861_v40  ;;  %v293_v38 = vld [vmem:[#allocation2 + $0x1e8] sm:$0xff]  ;;  %v1878_v39 = vcombine.low %v300_v27, %v308_v28  ;;  %v1880_v40 = vcombine.low %v301_v29, %v309_v30  ;;  %v1899_v27 = vcombine.high %v318_v21, %v326_v22  ;;  %v302_v29 = vld [vmem:[#allocation2 + $0x230] sm:$0xff] }
  0x6c   : > { %v1865_v42 = vcombine.high %v285_v37, %v293_v38  ;;  %v310_v30 = vld [vmem:[#allocation2 + $0x270] sm:$0xff] }
  0x6e   : > { %1091 = vmatpush1.bf16.msra.mxu0 %v1858_v45  ;;  %1132 = vmatpush1.bf16.msra.mxu1 %v1860_v46  ;;  %v269_v45 = vld [vmem:[#allocation2 + $0x128] sm:$0xff] }
  0x6f   : > { %1092 = vmatprep.subr.bf16.mxu0 %v1843_v47  ;;  %1133 = vmatprep.subr.bf16.mxu1 %v1845_v48  ;;  %v277_v46 = vld [vmem:[#allocation2 + $0x168] sm:$0xff]  ;;  %v1862_v47 = vcombine.low %v284_v35, %v292_v36  ;;  %v1864_v48 = vcombine.low %v285_v37, %v293_v38  ;;  %v1883_v35 = vcombine.high %v302_v29, %v310_v30  ;;  %v286_v37 = vld [vmem:[#allocation2 + $0x1b0] sm:$0xff] }
  0x70   : > { %v1849_v50 = vcombine.high %v269_v45, %v277_v46  ;;  %v294_v38 = vld [vmem:[#allocation2 + $0x1f0] sm:$0xff] }
  0x72   : > { %1093 = vmatpush1.bf16.msra.mxu0 %v1842_v53  ;;  %1134 = vmatpush1.bf16.msra.mxu1 %v1844_v54  ;;  %v253_v53 = vld [vmem:[#allocation2 + $0xa8] sm:$0xff] }
  0x73   : > { %1094 = vmatprep.subr.bf16.mxu0 %v1827_v55  ;;  %1135 = vmatprep.subr.bf16.mxu1 %v1829_v56  ;;  %v261_v54 = vld [vmem:[#allocation2 + $0xe8] sm:$0xff]  ;;  %v1846_v55 = vcombine.low %v268_v43, %v276_v44  ;;  %v1848_v56 = vcombine.low %v269_v45, %v277_v46  ;;  %v1867_v43 = vcombine.high %v286_v37, %v294_v38  ;;  %v270_v44 = vld [vmem:[#allocation2 + $0x130] sm:$0xff]  ;;  %v271_v46 = vld [vmem:[#allocation2 + $0x138] sm:$0xff] }
  0x74   : > { %v1833_v58 = vcombine.high %v253_v53, %v261_v54  ;;  %v278_v45 = vld [vmem:[#allocation2 + $0x170] sm:$0xff] }
  0x76   : > { %1095 = vmatpush1.bf16.msra.mxu0 %v1826_v61  ;;  %1136 = vmatpush1.bf16.msra.mxu1 %v1828_v62  ;;  %v237_v61 = vld [vmem:[#allocation2 + $0x28] sm:$0xff] }
  0x77   : > { %1096 = vmatprep.subr.bf16.mxu0 %v1811_v63  ;;  %1137 = vmatprep.subr.bf16.mxu1 %v1813_v1  ;;  %v245_v62 = vld [vmem:[#allocation2 + $0x68] sm:$0xff]  ;;  %v1830_v63 = vcombine.low %v252_v51, %v260_v52  ;;  %v1832_v1 = vcombine.low %v253_v53, %v261_v54  ;;  %v254_v52 = vld [vmem:[#allocation2 + $0xb0] sm:$0xff]  ;;  %v255_v54 = vld [vmem:[#allocation2 + $0xb8] sm:$0xff] }
  0x78   : > { %v1817_v3 = vcombine.high %v237_v61, %v245_v62  ;;  %v262_v53 = vld [vmem:[#allocation2 + $0xf0] sm:$0xff] }
  0x7a   : > { %1097 = vmatpush1.bf16.msra.mxu0 %v1810_v6  ;;  %1138 = vmatpush1.bf16.msra.mxu1 %v1812_v7  ;;  %v351_v6 = vld [vmem:[#allocation2 + $0x3b8] sm:$0xff] }
  0x7b   : > { %1164 = vmatprep.subr.bf16.mxu0 %v1927_v8  ;;  %1205 = vmatprep.subr.bf16.mxu1 %v1929_v9  ;;  %v359_v7 = vld [vmem:[#allocation2 + $0x3f8] sm:$0xff]  ;;  %v1814_v8 = vcombine.low %v236_v59, %v244_v60  ;;  %v1816_v9 = vcombine.low %v237_v61, %v245_v62  ;;  %v238_v60 = vld [vmem:[#allocation2 + $0x30] sm:$0xff] }
  0x7c   : > { %v1933_v11 = vcombine.high %v351_v6, %v359_v7  ;;  %v246_v61 = vld [vmem:[#allocation2 + $0x70] sm:$0xff]  ;;  %v239_v62 = vld [vmem:[#allocation2 + $0x38] sm:$0xff] }
  0x7d   : > { %1115 = vmatmul.mubr.bf16.vlgmr.msra.gmra.mxu0 %v2189_v12  ;;  %1156 = vmatmul.mubr.bf16.vlgmr.msra.gmra.mxu1 %v2189_v12 }
  0x7e   : > { %1165 = vmatpush1.bf16.msra.mxu0 %v1926_v15  ;;  %1206 = vmatpush1.bf16.msra.mxu1 %v1928_v16  ;;  %v335_v15 = vld [vmem:[#allocation2 + $0x338] sm:$0xff] }
  0x7f   : > { %1166 = vmatprep.subr.bf16.mxu0 %v1911_v17  ;;  %1207 = vmatprep.subr.bf16.mxu1 %v1913_v18  ;;  %v343_v16 = vld [vmem:[#allocation2 + $0x378] sm:$0xff]  ;;  %v1930_v17 = vcombine.low %v350_v4, %v358_v5  ;;  %v1932_v18 = vcombine.low %v351_v6, %v359_v7  ;;  %v1818_v5 = vcombine.low %v238_v60, %v246_v61 }
  0x80   : > { %1196 = vmatprep.mubr.bf16.mxu0 %v2086_v0  ;;  %1237 = vmatprep.mubr.bf16.mxu1 %v2086_v0  ;;  %v1917_v20 = vcombine.high %v335_v15, %v343_v16 }
  0x82   : > { %1167 = vmatpush1.bf16.msra.mxu0 %v1910_v23  ;;  %1208 = vmatpush1.bf16.msra.mxu1 %v1912_v24  ;;  %v319_v23 = vld [vmem:[#allocation2 + $0x2b8] sm:$0xff] }
  0x83   : > { %1168 = vmatprep.subr.bf16.mxu0 %v1895_v25  ;;  %1209 = vmatprep.subr.bf16.mxu1 %v1897_v26  ;;  %v327_v24 = vld [vmem:[#allocation2 + $0x2f8] sm:$0xff]  ;;  %v1914_v25 = vcombine.low %v334_v13, %v342_v14  ;;  %v1916_v26 = vcombine.low %v335_v15, %v343_v16  ;;  %v1332_v16 = vlaneseq }
  0x84   : > { %v1901_v28 = vcombine.high %v319_v23, %v327_v24 }
  0x86   : > { %1169 = vmatpush1.bf16.msra.mxu0 %v1894_v31  ;;  %1210 = vmatpush1.bf16.msra.mxu1 %v1896_v32  ;;  %v303_v31 = vld [vmem:[#allocation2 + $0x238] sm:$0xff] }
  0x87   : > { %1170 = vmatprep.subr.bf16.mxu0 %v1879_v33  ;;  %1211 = vmatprep.subr.bf16.mxu1 %v1881_v34  ;;  %v311_v32 = vld [vmem:[#allocation2 + $0x278] sm:$0xff]  ;;  %v1898_v33 = vcombine.low %v318_v21, %v326_v22  ;;  %v1900_v34 = vcombine.low %v319_v23, %v327_v24  ;;  %v2213_v22 = vld [vmem:[#allocation4] sm:$0xff] }
  0x88   : > { %v1885_v36 = vcombine.high %v303_v31, %v311_v32 }
  0x8a   : > { %1171 = vmatpush1.bf16.msra.mxu0 %v1878_v39  ;;  %1212 = vmatpush1.bf16.msra.mxu1 %v1880_v40  ;;  %v287_v39 = vld [vmem:[#allocation2 + $0x1b8] sm:$0xff] }
  0x8b   : > { %1172 = vmatprep.subr.bf16.mxu0 %v1863_v41  ;;  %1213 = vmatprep.subr.bf16.mxu1 %v1865_v42  ;;  %v295_v40 = vld [vmem:[#allocation2 + $0x1f8] sm:$0xff]  ;;  %v1882_v41 = vcombine.low %v302_v29, %v310_v30  ;;  %v1884_v42 = vcombine.low %v303_v31, %v311_v32 }
  0x8e   : > { %1173 = vmatpush1.bf16.msra.mxu0 %v1862_v47  ;;  %1214 = vmatpush1.bf16.msra.mxu1 %v1864_v48  ;;  %v279_v47 = vld [vmem:[#allocation2 + $0x178] sm:$0xff]  ;;  %v1866_v48 = vcombine.low %v286_v37, %v294_v38  ;;  %v2087_v38 = vmov 1966171168  }
  0x8f   : > { %1174 = vmatprep.subr.bf16.mxu0 %v1847_v49  ;;  %1215 = vmatprep.subr.bf16.mxu1 %v1849_v50  ;;  %v1868_v49 = vcombine.low %v287_v39, %v295_v40  ;;  %v1851_v50 = vcombine.high %v270_v44, %v278_v45  ;;  %v1853_v51 = vcombine.high %v271_v46, %v279_v47 }
  0x92   : > { %1175 = vmatpush1.bf16.msra.mxu0 %v1846_v55  ;;  %1216 = vmatpush1.bf16.msra.mxu1 %v1848_v56  ;;  %v263_v55 = vld [vmem:[#allocation2 + $0xf8] sm:$0xff]  ;;  %v1850_v56 = vcombine.low %v270_v44, %v278_v45 }
  0x93   : > { %1176 = vmatprep.subr.bf16.mxu0 %v1831_v57  ;;  %1217 = vmatprep.subr.bf16.mxu1 %v1833_v58  ;;  %v1852_v57 = vcombine.low %v271_v46, %v279_v47  ;;  %v1835_v58 = vcombine.high %v254_v52, %v262_v53  ;;  %v1837_v59 = vcombine.high %v255_v54, %v263_v55 }
  0x96   : > { %1177 = vmatpush1.bf16.msra.mxu0 %v1830_v63  ;;  %1218 = vmatpush1.bf16.msra.mxu1 %v1832_v1  ;;  %v247_v63 = vld [vmem:[#allocation2 + $0x78] sm:$0xff]  ;;  %v1834_v1 = vcombine.low %v254_v52, %v262_v53 }
  0x97   : > { %1178 = vmatprep.subr.bf16.mxu0 %v1815_v2  ;;  %1219 = vmatprep.subr.bf16.mxu1 %v1817_v3  ;;  %v1836_v2 = vcombine.low %v255_v54, %v263_v55  ;;  %v1819_v3 = vcombine.high %v238_v60, %v246_v61  ;;  %v1821_v4 = vcombine.high %v239_v62, %v247_v63 }
  0x98   : > { %v1820_v6 = vcombine.low %v239_v62, %v247_v63 }
  0x9a   : > { %1179 = vmatpush1.bf16.msra.mxu0 %v1814_v8  ;;  %1220 = vmatpush1.bf16.msra.mxu1 %v1816_v9 }
  0x9b   : > { %1246 = vmatprep.subr.bf16.mxu0 %v1931_v10  ;;  %1287 = vmatprep.subr.bf16.mxu1 %v1933_v11 }
  0x9d   : > { %1197 = vmatmul.mubr.bf16.vlgmr.msra.gmra.mxu0 %v2189_v12  ;;  %1238 = vmatmul.mubr.bf16.vlgmr.msra.gmra.mxu1 %v2189_v12 }
  0x9e   : > { %1247 = vmatpush1.bf16.msra.mxu0 %v1930_v17  ;;  %1288 = vmatpush1.bf16.msra.mxu1 %v1932_v18  ;;  %v1333_v17 = vshrl.u32 %v1332_v16, 7 }
  0x9f   : > { %1248 = vmatprep.subr.bf16.mxu0 %v1915_v19  ;;  %1289 = vmatprep.subr.bf16.mxu1 %v1917_v20 }
  0xa0   : > { %1278 = vmatprep.mubr.bf16.mxu0 %v2086_v0  ;;  %1319 = vmatprep.mubr.bf16.mxu1 %v2086_v0  ;;  %v1869_v0 = vcombine.high %v287_v39, %v295_v40  ;;  %v2205_v18 = vsub.s32 0, %v1333_v17  ;;  %v2207_v19 = vsub.s32 2, %v1333_v17  ;;  %v2209_v20 = vsub.s32 1, %v1333_v17 }
  0xa1   : > { %v2211_v21 = vsub.s32 3, %v1333_v17  ;;  %v2241_v37 = vsub.s32 4, %v1333_v17  ;;  %v1581_v39 = vunpack.c.l.s4 %v2087_v38  ;;  %v2247_v40 = vsub.s32 6, %v1333_v17 }
  0xa2   : > { %1249 = vmatpush1.bf16.msra.mxu0 %v1914_v25  ;;  %1290 = vmatpush1.bf16.msra.mxu1 %v1916_v26  ;;  %v1335_v23 = vrot.slane %v2213_v22, %v2205_v18  ;;  %v1343_v24 = vrot.slane %v2213_v22, %v2207_v19  ;;  %v1339_v25 = vrot.slane %v2213_v22, %v2209_v20 }
  0xa3   : > { %1250 = vmatprep.subr.bf16.mxu0 %v1899_v27  ;;  %1291 = vmatprep.subr.bf16.mxu1 %v1901_v28  ;;  %v1347_v26 = vrot.slane %v2213_v22, %v2211_v21  ;;  %v1351_v46 = vrot.slane %v2213_v22, %v2241_v37 }
  0xa6   : > { %1251 = vmatpush1.bf16.msra.mxu0 %v1898_v33  ;;  %1292 = vmatpush1.bf16.msra.mxu1 %v1900_v34 }
  0xa7   : > { %1252 = vmatprep.subr.bf16.mxu0 %v1883_v35  ;;  %1293 = vmatprep.subr.bf16.mxu1 %v1885_v36 }
  0xaa   : > { %1253 = vmatpush1.bf16.msra.mxu0 %v1882_v41  ;;  %1294 = vmatpush1.bf16.msra.mxu1 %v1884_v42  ;;  %v2249_v41 = vsub.s32 5, %v1333_v17  ;;  %v2251_v42 = vsub.s32 7, %v1333_v17 }
  0xab   : > { %1254 = vmatprep.subr.bf16.mxu0 %v1867_v43  ;;  %1295 = vmatprep.subr.bf16.mxu1 %v1869_v0 }
  0xac   : > { %v1363_v54 = vrot.slane %v2213_v22, %v2251_v42 }
  0xae   : > { %1255 = vmatpush1.bf16.msra.mxu0 %v1866_v48  ;;  %1296 = vmatpush1.bf16.msra.mxu1 %v1868_v49  ;;  %v1582_v48 = vunpack.c.0.s8 %v1581_v39 }
  0xaf   : > { %1256 = vmatprep.subr.bf16.mxu0 %v1851_v50  ;;  %1297 = vmatprep.subr.bf16.mxu1 %v1853_v51  ;;  %v1359_v50 = vrot.slane %v2213_v22, %v2247_v40  ;;  %v1355_v51 = vrot.slane %v2213_v22, %v2249_v41 }
  0xb0   : > { %v2279_v63 = vsub.s32 %v1582_v48, %v1333_v17 }
  0xb2   : > { %1257 = vmatpush1.bf16.msra.mxu0 %v1850_v56  ;;  %1298 = vmatpush1.bf16.msra.mxu1 %v1852_v57 }
  0xb3   : > { %1258 = vmatprep.subr.bf16.mxu0 %v1835_v58  ;;  %1299 = vmatprep.subr.bf16.mxu1 %v1837_v59 }
  0xb6   : > { %1259 = vmatpush1.bf16.msra.mxu0 %v1834_v1  ;;  %1300 = vmatpush1.bf16.msra.mxu1 %v1836_v2 }
  0xb7   : > { %1260 = vmatprep.subr.bf16.mxu0 %v1819_v3  ;;  %1301 = vmatprep.subr.bf16.mxu1 %v1821_v4 }
  0xba   : > { %1261 = vmatpush1.bf16.msra.mxu0 %v1818_v5  ;;  %1302 = vmatpush1.bf16.msra.mxu1 %v1820_v6 }
  0xbd   : > { %1279 = vmatmul.mubr.bf16.vlgmr.msra.gmra.mxu0 %v2189_v12  ;;  %1320 = vmatmul.mubr.bf16.vlgmr.msra.gmra.mxu1 %v2189_v12  ;;  %v2215_v12 = vld [vmem:[#allocation6] sm:$0xff] }
  0xbe   : > { %v1435_v28 = vrot.slane %v2215_v12, %v2205_v18  ;;  %v1443_v29 = vrot.slane %v2215_v12, %v2207_v19  ;;  %v1439_v30 = vrot.slane %v2215_v12, %v2209_v20  ;;  %v1447_v32 = vrot.slane %v2215_v12, %v2211_v21 }
  0xbf   : > { %v1451_v49 = vrot.slane %v2215_v12, %v2241_v37  ;;  %v1459_v53 = vrot.slane %v2215_v12, %v2247_v40  ;;  %v1455_v62 = vrot.slane %v2215_v12, %v2249_v41  ;;  %v1463_v3 = vrot.slane %v2215_v12, %v2251_v42 }
 0x11d   : > { %v1034_v7 = vpop.f32.mrf.mxu0  ;;  %v1075_v8 = vpop.f32.mrf.mxu1 }
 0x11e   : > { %v1412_v33 = vmul.f32 %v1335_v23, %v1034_v7  ;;  %v1414_v34 = vmul.f32 %v1343_v24, %v1075_v8 }
 0x11f   : > { %v1036_v9 = vpop.f32.mrf.mxu0  ;;  %v1077_v10 = vpop.f32.mrf.mxu1 }
 0x120   : > { %v1413_v35 = vmul.f32 %v1339_v25, %v1036_v9  ;;  %v1415_v36 = vmul.f32 %v1347_v26, %v1077_v10  ;;  %v1512_v43 = vadd.f32 %v1435_v28, %v1412_v33  ;;  %v1514_v0 = vadd.f32 %v1443_v29, %v1414_v34 }
 0x121   : > { %v1038_v11 = vpop.f32.mrf.mxu0  ;;  %v1079_v13 = vpop.f32.mrf.mxu1 }
 0x122   : > { %v1513_v44 = vadd.f32 %v1439_v30, %v1413_v35  ;;  %v1515_v45 = vadd.f32 %v1447_v32, %v1415_v36  ;;  %v1528_v55 = vmax.f32 %v1512_v43, 0.0  ;;  %v1530_v56 = vmax.f32 %v1514_v0, 0.0  ;;  %v1707_v43 = vld [vmem:[%s2313_s17] sm:$0xff] }
 0x123   : > { %v1039_v14 = vpop.f32.mrf.mxu0  ;;  %v1080_v15 = vpop.f32.mrf.mxu1 }
 0x124   : > { %v1529_v57 = vmax.f32 %v1513_v44, 0.0  ;;  %v1531_v58 = vmax.f32 %v1515_v45, 0.0 }
 0x126   : > { %v1934_v7 = vpack.c.bf16 %v1529_v57, %v1528_v55  ;;  %v1935_v8 = vpack.c.bf16 %v1531_v58, %v1530_v56  ;;  %v1429_v55 = vld [vmem:[#allocation6 + $0x8] sm:$0xff] }
 0x127   : > { %v1487_v12 = vrot.slane %v1429_v55, %v2249_v41 }
 0x128   : > { %v1586_v26 = vrot.slane %v1934_v7, %v2279_v63  ;;  %v1593_v27 = vrot.slane %v1935_v8, %v2279_v63 }
 0x12a   : > { %v1608_v32 = vcombine.low %v1586_v26, %v1593_v27 }
 0x12c   : > { %v1616_v38 = vrot.slane %v1608_v32, %v2279_v63 }
 0x13d   : > { %v1116_v59 = vpop.f32.mrf.mxu0  ;;  %v1157_v61 = vpop.f32.mrf.mxu1 }
 0x13e   : > { %v1416_v60 = vmul.f32 %v1351_v46, %v1116_v59  ;;  %v1418_v1 = vmul.f32 %v1359_v50, %v1157_v61  ;;  %v1467_v59 = vrot.slane %v1429_v55, %v2205_v18  ;;  %v1471_v61 = vrot.slane %v1429_v55, %v2209_v20 }
 0x13f   : > { %v1118_v2 = vpop.f32.mrf.mxu0  ;;  %v1159_v6 = vpop.f32.mrf.mxu1 }
 0x140   : > { %v1516_v4 = vadd.f32 %v1451_v49, %v1416_v60  ;;  %v1417_v5 = vmul.f32 %v1355_v51, %v1118_v2  ;;  %v1518_v9 = vadd.f32 %v1459_v53, %v1418_v1  ;;  %v1419_v10 = vmul.f32 %v1363_v54, %v1159_v6  ;;  %v1329_v53 = vld [vmem:[#allocation4 + $0x8] sm:$0xff] }
 0x141   : > { %v1120_v11 = vpop.f32.mrf.mxu0  ;;  %v1161_v16 = vpop.f32.mrf.mxu1  ;;  %v1367_v54 = vrot.slane %v1329_v53, %v2205_v18  ;;  %v1375_v56 = vrot.slane %v1329_v53, %v2207_v19  ;;  %v1371_v57 = vrot.slane %v1329_v53, %v2209_v20  ;;  %v1379_v58 = vrot.slane %v1329_v53, %v2211_v21 }
 0x142   : > { %v1532_v13 = vmax.f32 %v1516_v4, 0.0  ;;  %v1517_v14 = vadd.f32 %v1455_v62, %v1417_v5  ;;  %v1534_v17 = vmax.f32 %v1518_v9, 0.0  ;;  %v1519_v22 = vadd.f32 %v1463_v3, %v1419_v10 }
 0x143   : > { %v1121_v23 = vpop.f32.mrf.mxu0  ;;  %v1162_v25 = vpop.f32.mrf.mxu1  ;;  %v1475_v60 = vrot.slane %v1429_v55, %v2207_v19  ;;  %v1479_v62 = vrot.slane %v1429_v55, %v2211_v21  ;;  %v1383_v9 = vrot.slane %v1329_v53, %v2241_v37  ;;  %v1391_v10 = vrot.slane %v1329_v53, %v2247_v40 }
 0x144   : > { %v1533_v24 = vmax.f32 %v1517_v14, 0.0  ;;  %v1535_v28 = vmax.f32 %v1519_v22, 0.0  ;;  %v1483_v18 = vrot.slane %v1429_v55, %v2241_v37  ;;  %v1491_v19 = vrot.slane %v1429_v55, %v2247_v40 }
 0x145   : > { %v1387_v20 = vrot.slane %v1329_v53, %v2249_v41  ;;  %v1395_v21 = vrot.slane %v1329_v53, %v2251_v42  ;;  %v1495_v25 = vrot.slane %v1429_v55, %v2251_v42 }
 0x146   : > { %v1936_v29 = vpack.c.bf16 %v1533_v24, %v1532_v13  ;;  %v1937_v30 = vpack.c.bf16 %v1535_v28, %v1534_v17 }
 0x148   : > { %v1600_v31 = vrot.slane %v1936_v29, %v2279_v63  ;;  %v1607_v33 = vrot.slane %v1937_v30, %v2279_v63 }
 0x14a   : > { %v1609_v35 = vcombine.low %v1600_v31, %v1607_v33 }
 0x14c   : > { %v1623_v39 = vrot.slane %v1609_v35, %v2279_v63 }
 0x14e   : > { %v1624_v0 = vcombine.low %v1616_v38, %v1623_v39 }
 0x150   : > { %v1708_v44 = vsel %vm1706_vm14, %v1624_v0, %v1707_v43 }
 0x151   : > { %1709 = vst [vmem:[%s2313_s17] sm:$0xff] %v1708_v44 }
 0x15d   : > { %v1198_v45 = vpop.f32.mrf.mxu0  ;;  %v1239_v46 = vpop.f32.mrf.mxu1 }
 0x15e   : > { %v1420_v1 = vmul.f32 %v1367_v54, %v1198_v45  ;;  %v1422_v2 = vmul.f32 %v1375_v56, %v1239_v46  ;;  %v1710_v54 = vld [vmem:[%s2313_s17 + $0x8] sm:$0xff] }
 0x15f   : > { %v1200_v47 = vpop.f32.mrf.mxu0  ;;  %v1241_v48 = vpop.f32.mrf.mxu1 }
 0x160   : > { %v1421_v3 = vmul.f32 %v1371_v57, %v1200_v47  ;;  %v1423_v4 = vmul.f32 %v1379_v58, %v1241_v48  ;;  %v1520_v5 = vadd.f32 %v1467_v59, %v1420_v1  ;;  %v1522_v6 = vadd.f32 %v1475_v60, %v1422_v2 }
 0x161   : > { %v1202_v49 = vpop.f32.mrf.mxu0  ;;  %v1243_v50 = vpop.f32.mrf.mxu1 }
 0x162   : > { %v1521_v7 = vadd.f32 %v1471_v61, %v1421_v3  ;;  %v1523_v8 = vadd.f32 %v1479_v62, %v1423_v4  ;;  %v1536_v11 = vmax.f32 %v1520_v5, 0.0  ;;  %v1538_v13 = vmax.f32 %v1522_v6, 0.0 }
 0x163   : > { %v1203_v51 = vpop.f32.mrf.mxu0  ;;  %v1244_v52 = vpop.f32.mrf.mxu1 }
 0x164   : > { %v1537_v14 = vmax.f32 %v1521_v7, 0.0  ;;  %v1539_v15 = vmax.f32 %v1523_v8, 0.0 }
 0x166   : > { %v1938_v27 = vpack.c.bf16 %v1537_v14, %v1536_v11  ;;  %v1939_v28 = vpack.c.bf16 %v1539_v15, %v1538_v13 }
 0x168   : > { %v1635_v0 = vrot.slane %v1938_v27, %v2279_v63  ;;  %v1642_v42 = vrot.slane %v1939_v28, %v2279_v63 }
 0x16a   : > { %v1657_v49 = vcombine.low %v1635_v0, %v1642_v42 }
 0x16c   : > { %v1665_v52 = vrot.slane %v1657_v49, %v2279_v63 }
 0x17d   : > { %v1280_v16 = vpop.f32.mrf.mxu0  ;;  %v1321_v22 = vpop.f32.mrf.mxu1 }
 0x17e   : > { %v1424_v17 = vmul.f32 %v1383_v9, %v1280_v16  ;;  %v1426_v23 = vmul.f32 %v1391_v10, %v1321_v22 }
 0x17f   : > { %v1282_v24 = vpop.f32.mrf.mxu0  ;;  %v1323_v40 = vpop.f32.mrf.mxu1 }
 0x180   : > { %v1524_v37 = vadd.f32 %v1483_v18, %v1424_v17  ;;  %v1425_v26 = vmul.f32 %v1387_v20, %v1282_v24  ;;  %v1526_v29 = vadd.f32 %v1491_v19, %v1426_v23  ;;  %v1427_v30 = vmul.f32 %v1395_v21, %v1323_v40 }
 0x181   : > { %v1284_v31 = vpop.f32.mrf.mxu0  ;;  %v1325_v33 = vpop.f32.mrf.mxu1 }
 0x182   : > { %v1525_v32 = vadd.f32 %v1487_v12, %v1425_v26  ;;  %v1527_v35 = vadd.f32 %v1495_v25, %v1427_v30  ;;  %v1540_v39 = vmax.f32 %v1524_v37, 0.0  ;;  %v1542_v44 = vmax.f32 %v1526_v29, 0.0 }
 0x183   : > { %v1285_v38 = vpop.f32.mrf.mxu0  ;;  %v1326_v41 = vpop.f32.mrf.mxu1 }
 0x184   : > { %v1541_v43 = vmax.f32 %v1525_v32, 0.0  ;;  %v1543_v45 = vmax.f32 %v1527_v35, 0.0 }
 0x186   : > { %v1940_v46 = vpack.c.bf16 %v1541_v43, %v1540_v39  ;;  %v1941_v47 = vpack.c.bf16 %v1543_v45, %v1542_v44 }
 0x188   : > { %v1649_v48 = vrot.slane %v1940_v46, %v2279_v63  ;;  %v1656_v50 = vrot.slane %v1941_v47, %v2279_v63 }
 0x18a   : > { %v1658_v51 = vcombine.low %v1649_v48, %v1656_v50 }
 0x18c   : > { %v1672_v53 = vrot.slane %v1658_v51, %v2279_v63 }
 0x18e   : > { %v1673_v55 = vcombine.low %v1665_v52, %v1672_v53 }
 0x190   : > { %v1711_v56 = vsel %vm1706_vm14, %v1673_v55, %v1710_v54 }
 0x191   : > { %1712 = vst [vmem:[%s2313_s17 + $0x8] sm:$0xff] %v1711_v56 }
 0x192 PF: > { %s16_s15 = sadd.s32 1, %s2079_s15  }
 0x193   : > { %p13_p8 = scmp.ge.s32.totalorder %s16_s15, 4  }
 0x195   :  { %15 = sbr.rel (!%p13_p8) target bundleno = 2 (0x2), region = 79 }
 0x19a   :  { %1732 = vsyncpa [#allocation3], 1 }
 0x19b   :  { %1734 = vsyncpa [#allocation3 + $0x1], 1 }
 0x19c   :  { %1735 = vsyncpa [#allocation5], 1 }

</bundles_post_ra>
